<compile_context>
chip_gen: v7x
topology: tpu7x:2x2x1
jax: 0.10.0
libtpu: 0.0.40
codegen_flags: <defaults>
</compile_context>

<pallas_src>
import math

import jax
import jax.numpy as jnp
import numpy as np
from jax import lax
from jax.experimental import pallas as pl
from jax.experimental.pallas import tpu as pltpu

D_MODEL = 4
N_HEADS = 4
DIM_FF = 4
HEAD_DIM = D_MODEL // N_HEADS          # == 1
LN_EPS = 1e-5

SEQ = 3
BATCH = 5

# Packed parameter slab: ONE (8,128) f32 tile.
#   rows 0:4 lanes  0:12  wqkv = [wq*scale | wk | wv]
#   rows 0:4 lanes 12:16  wo
#   rows 0:4 lanes 16:20  w1
#   rows 0:4 lanes 20:24  w2
#   row  4   lanes  0:12  bqkv   12:16 bo   16:20 b1   20:24 b2
#            lanes 24:28  ln1_g  28:32 ln1_b 32:36 ln2_g 36:40 ln2_b
SLAB_ROWS = 8
SLAB_LANES = 128


def _mm(a, w):
    """(..., IN) x (IN, OUT) contraction as IN lane-broadcast FMAs on the VPU.

    With IN = 4 the MXU would be pure pipeline latency (4 serially dependent
    pushes + result-FIFO drains); 4 exact f32 multiply-adds on the VPU are
    shorter-latency and keep full f32 accuracy on every TPU generation.
    """
    out = a[..., 0:1] * w[0:1, :]
    for k in range(1, w.shape[0]):
        out = out + a[..., k:k + 1] * w[k:k + 1, :]
    return out


def _layernorm(h, g, b):
    # Centered two-pass variance (avoids E[x^2]-E[x]^2 cancellation).
    mu = jnp.mean(h, axis=-1, keepdims=True)
    d = h - mu
    var = jnp.mean(d * d, axis=-1, keepdims=True)
    return d * lax.rsqrt(var + LN_EPS) * g + b


def encoder_layer_kernel(x_ref, p_ref, o_ref):
    x = x_ref[...]                                     # (SEQ, BATCH, E), f32

    # Static slices of the single packed-parameter tile (free).
    wqkv = p_ref[0:4, 0:3 * D_MODEL]
    wo = p_ref[0:4, 12:16]
    w1 = p_ref[0:4, 16:20]
    w2 = p_ref[0:4, 20:24]
    bqkv = p_ref[4:5, 0:12]
    bo = p_ref[4:5, 12:16]
    b1 = p_ref[4:5, 16:20]
    b2 = p_ref[4:5, 20:24]
    g1 = p_ref[4:5, 24:28]
    be1 = p_ref[4:5, 28:32]
    g2 = p_ref[4:5, 32:36]
    be2 = p_ref[4:5, 36:40]

    # Fused Q/K/V projection for all heads / positions / batch in one shot.
    # (1/sqrt(head_dim) is folded into wq / bq in the slab.)
    qkv = _mm(x, wqkv) + bqkv                          # (SEQ, BATCH, 3E)
    q = qkv[..., 0:D_MODEL]
    k = qkv[..., D_MODEL:2 * D_MODEL]
    v = qkv[..., 2 * D_MODEL:3 * D_MODEL]

    # head_dim == 1  =>  the E axis IS the head axis, so q.k is elementwise.
    # Broadcasting k[j] / v[j] across the query (major) axis yields all-pairs
    # scores with zero data movement: s[j][i] = q[i] * k[j].
    s = [q * k[j:j + 1] for j in range(SEQ)]
    m = s[0]
    for j in range(1, SEQ):
        m = jnp.maximum(m, s[j])
    e = [jnp.exp(sj - m) for sj in s]
    den = e[0]
    num = e[0] * v[0:1]
    for j in range(1, SEQ):
        den = den + e[j]
        num = num + e[j] * v[j:j + 1]
    # EUP approximate reciprocal + one Newton step (keeps the divide off VALU,
    # error ~1e-7 -- do not drop the Newton step).
    r = pl.reciprocal(den, approx=True)
    r = r * (2.0 - den * r)
    attn = num * r                                     # (SEQ, BATCH, E)

    a_out = _mm(attn, wo) + bo                         # output projection
    h1 = _layernorm(x + a_out, g1, be1)                # residual + LN1
    ff = _mm(jnp.maximum(_mm(h1, w1) + b1, 0.0), w2) + b2
    o_ref[...] = _layernorm(h1 + ff, g2, be2).astype(o_ref.dtype)


@jax.jit
def transformer_encoder_layer(x, p_slab):
    # Single dispatch: no host-side padding / reshape / slice around the call.
    vmem = pl.BlockSpec(memory_space=pltpu.MemorySpace.VMEM)
    return pl.pallas_call(
        encoder_layer_kernel,
        out_shape=jax.ShapeDtypeStruct(x.shape, x.dtype),
        in_specs=[vmem, vmem],
        out_specs=vmem,
    )(x, p_slab)


def init_params(key):
    E, F = D_MODEL, DIM_FF
    ks = jax.random.split(key, 12)

    def w(k, shape, scale=0.3):
        return (scale * jax.random.normal(k, shape)).astype(jnp.float32)

    return dict(
        wq=w(ks[0], (E, E)), wk=w(ks[1], (E, E)), wv=w(ks[2], (E, E)),
        wo=w(ks[3], (E, E)),
        w1=w(ks[4], (E, F)), w2=w(ks[5], (F, E)),
        bq=w(ks[6], (1, E), 0.1), bk=w(ks[7], (1, E), 0.1),
        bv=w(ks[8], (1, E), 0.1), bo=w(ks[9], (1, E), 0.1),
        b1=w(ks[10], (1, F), 0.1), b2=w(ks[11], (1, E), 0.1),
        g1=jnp.ones((1, E), jnp.float32), be1=jnp.zeros((1, E), jnp.float32),
        g2=jnp.ones((1, E), jnp.float32), be2=jnp.zeros((1, E), jnp.float32),
    )


def pack_params(p):
    # One-time parameter packing into a single (8,128) tile; attention scale
    # folded into wq/bq here (not per call).
    scale = 1.0 / math.sqrt(HEAD_DIM)
    wqkv = jnp.concatenate([p["wq"] * scale, p["wk"], p["wv"]], axis=1)  # (4,12)
    bqkv = jnp.concatenate([p["bq"] * scale, p["bk"], p["bv"]], axis=1)  # (1,12)
    bias_row = jnp.concatenate(
        [bqkv, p["bo"], p["b1"], p["b2"],
         p["g1"], p["be1"], p["g2"], p["be2"]], axis=1)                  # (1,40)
    slab = jnp.zeros((SLAB_ROWS, SLAB_LANES), jnp.float32)
    slab = slab.at[0:4, 0:12].set(wqkv)
    slab = slab.at[0:4, 12:16].set(p["wo"])
    slab = slab.at[0:4, 16:20].set(p["w1"])
    slab = slab.at[0:4, 20:24].set(p["w2"])
    slab = slab.at[4:5, 0:40].set(bias_row)
    return slab


def reference(x, p):
    # Pure-JAX reference (head_dim == 1, so the E axis is the head axis).
    hp = jax.lax.Precision.HIGHEST
    scale = 1.0 / math.sqrt(HEAD_DIM)
    q = (jnp.einsum('sne,ef->snf', x, p["wq"], precision=hp) + p["bq"][0]) * scale
    k = jnp.einsum('sne,ef->snf', x, p["wk"], precision=hp) + p["bk"][0]
    v = jnp.einsum('sne,ef->snf', x, p["wv"], precision=hp) + p["bv"][0]
    scores = jnp.einsum('ine,jne->ijne', q, k, precision=hp)
    pattn = jax.nn.softmax(scores, axis=1)
    attn = jnp.einsum('ijne,jne->ine', pattn, v, precision=hp)
    a_out = jnp.einsum('ine,ef->inf', attn, p["wo"], precision=hp) + p["bo"][0]

    def ln(h, g, b):
        mu = h.mean(-1, keepdims=True)
        var = ((h - mu) ** 2).mean(-1, keepdims=True)
        return (h - mu) / jnp.sqrt(var + LN_EPS) * g[0] + b[0]

    h1 = ln(x + a_out, p["g1"], p["be1"])
    ff = jnp.maximum(
        jnp.einsum('ine,ef->inf', h1, p["w1"], precision=hp) + p["b1"][0], 0.0)
    ff = jnp.einsum('inf,fe->ine', ff, p["w2"], precision=hp) + p["b2"][0]
    return ln(h1 + ff, p["g2"], p["be2"])


if __name__ == "__main__":
    key = jax.random.PRNGKey(0)
    kx, kp = jax.random.split(key)
    x1 = jax.random.normal(kx, (SEQ, BATCH, D_MODEL), dtype=jnp.float32)
    params = init_params(kp)
    slab = pack_params(params)

    out = transformer_encoder_layer(x1, slab)
    out = jax.block_until_ready(out)

    ref = reference(x1, params)
    assert out.shape == (SEQ, BATCH, D_MODEL)
    np.testing.assert_allclose(np.asarray(out), np.asarray(ref),
                               rtol=2e-4, atol=2e-4)
    print("KERNEL_OK")
</pallas_src>

<mosaic_0001>
module attributes {stable_mosaic.version = 11 : i64} {
  func.func @encoder_layer_kernel(%arg0: memref<3x5x4xf32, #tpu.memory_space<vmem>>, %arg1: memref<8x128xf32, #tpu.memory_space<vmem>>, %arg2: memref<3x5x4xf32, #tpu.memory_space<vmem>>) attributes {dimension_semantics = [], scalar_prefetch = 0 : i64, scratch_operands = 0 : i64, tpu.core_type = #tpu.core_type<tc>} {
    %c0 = arith.constant 0 : index
    %c0_0 = arith.constant 0 : index
    %c0_1 = arith.constant 0 : index
    %0 = vector.load %arg0[%c0, %c0_0, %c0_1] : memref<3x5x4xf32, #tpu.memory_space<vmem>>, vector<3x5x4xf32>
    %c0_2 = arith.constant 0 : index
    %c0_3 = arith.constant 0 : index
    %1 = vector.load %arg1[%c0_2, %c0_3] : memref<8x128xf32, #tpu.memory_space<vmem>>, vector<4x12xf32>
    %c0_4 = arith.constant 0 : index
    %c12 = arith.constant 12 : index
    %2 = vector.load %arg1[%c0_4, %c12] : memref<8x128xf32, #tpu.memory_space<vmem>>, vector<4x4xf32>
    %c0_5 = arith.constant 0 : index
    %c16 = arith.constant 16 : index
    %3 = vector.load %arg1[%c0_5, %c16] : memref<8x128xf32, #tpu.memory_space<vmem>>, vector<4x4xf32>
    %c0_6 = arith.constant 0 : index
    %c20 = arith.constant 20 : index
    %4 = vector.load %arg1[%c0_6, %c20] : memref<8x128xf32, #tpu.memory_space<vmem>>, vector<4x4xf32>
    %c4 = arith.constant 4 : index
    %c0_7 = arith.constant 0 : index
    %5 = vector.load %arg1[%c4, %c0_7] : memref<8x128xf32, #tpu.memory_space<vmem>>, vector<1x12xf32>
    %c4_8 = arith.constant 4 : index
    %c12_9 = arith.constant 12 : index
    %6 = vector.load %arg1[%c4_8, %c12_9] : memref<8x128xf32, #tpu.memory_space<vmem>>, vector<1x4xf32>
    %c4_10 = arith.constant 4 : index
    %c16_11 = arith.constant 16 : index
    %7 = vector.load %arg1[%c4_10, %c16_11] : memref<8x128xf32, #tpu.memory_space<vmem>>, vector<1x4xf32>
    %c4_12 = arith.constant 4 : index
    %c20_13 = arith.constant 20 : index
    %8 = vector.load %arg1[%c4_12, %c20_13] : memref<8x128xf32, #tpu.memory_space<vmem>>, vector<1x4xf32>
    %c4_14 = arith.constant 4 : index
    %c24 = arith.constant 24 : index
    %9 = vector.load %arg1[%c4_14, %c24] : memref<8x128xf32, #tpu.memory_space<vmem>>, vector<1x4xf32>
    %c4_15 = arith.constant 4 : index
    %c28 = arith.constant 28 : index
    %10 = vector.load %arg1[%c4_15, %c28] : memref<8x128xf32, #tpu.memory_space<vmem>>, vector<1x4xf32>
    %c4_16 = arith.constant 4 : index
    %c32 = arith.constant 32 : index
    %11 = vector.load %arg1[%c4_16, %c32] : memref<8x128xf32, #tpu.memory_space<vmem>>, vector<1x4xf32>
    %c4_17 = arith.constant 4 : index
    %c36 = arith.constant 36 : index
    %12 = vector.load %arg1[%c4_17, %c36] : memref<8x128xf32, #tpu.memory_space<vmem>>, vector<1x4xf32>
    %13 = vector.extract_strided_slice %0 {offsets = [0, 0, 0], sizes = [3, 5, 1], strides = [1, 1, 1]} : vector<3x5x4xf32> to vector<3x5x1xf32>
    %14 = vector.extract_strided_slice %1 {offsets = [0, 0], sizes = [1, 12], strides = [1, 1]} : vector<4x12xf32> to vector<1x12xf32>
    %15 = vector.shape_cast %14 : vector<1x12xf32> to vector<1x1x12xf32>
    %16 = vector.broadcast %13 : vector<3x5x1xf32> to vector<3x5x12xf32>
    %17 = vector.broadcast %15 : vector<1x1x12xf32> to vector<3x5x12xf32>
    %18 = arith.mulf %16, %17 : vector<3x5x12xf32>
    %19 = vector.extract_strided_slice %0 {offsets = [0, 0, 1], sizes = [3, 5, 1], strides = [1, 1, 1]} : vector<3x5x4xf32> to vector<3x5x1xf32>
    %20 = vector.extract_strided_slice %1 {offsets = [1, 0], sizes = [1, 12], strides = [1, 1]} : vector<4x12xf32> to vector<1x12xf32>
    %21 = vector.shape_cast %20 : vector<1x12xf32> to vector<1x1x12xf32>
    %22 = vector.broadcast %19 : vector<3x5x1xf32> to vector<3x5x12xf32>
    %23 = vector.broadcast %21 : vector<1x1x12xf32> to vector<3x5x12xf32>
    %24 = arith.mulf %22, %23 : vector<3x5x12xf32>
    %25 = arith.addf %18, %24 : vector<3x5x12xf32>
    %26 = vector.extract_strided_slice %0 {offsets = [0, 0, 2], sizes = [3, 5, 1], strides = [1, 1, 1]} : vector<3x5x4xf32> to vector<3x5x1xf32>
    %27 = vector.extract_strided_slice %1 {offsets = [2, 0], sizes = [1, 12], strides = [1, 1]} : vector<4x12xf32> to vector<1x12xf32>
    %28 = vector.shape_cast %27 : vector<1x12xf32> to vector<1x1x12xf32>
    %29 = vector.broadcast %26 : vector<3x5x1xf32> to vector<3x5x12xf32>
    %30 = vector.broadcast %28 : vector<1x1x12xf32> to vector<3x5x12xf32>
    %31 = arith.mulf %29, %30 : vector<3x5x12xf32>
    %32 = arith.addf %25, %31 : vector<3x5x12xf32>
    %33 = vector.extract_strided_slice %0 {offsets = [0, 0, 3], sizes = [3, 5, 1], strides = [1, 1, 1]} : vector<3x5x4xf32> to vector<3x5x1xf32>
    %34 = vector.extract_strided_slice %1 {offsets = [3, 0], sizes = [1, 12], strides = [1, 1]} : vector<4x12xf32> to vector<1x12xf32>
    %35 = vector.shape_cast %34 : vector<1x12xf32> to vector<1x1x12xf32>
    %36 = vector.broadcast %33 : vector<3x5x1xf32> to vector<3x5x12xf32>
    %37 = vector.broadcast %35 : vector<1x1x12xf32> to vector<3x5x12xf32>
    %38 = arith.mulf %36, %37 : vector<3x5x12xf32>
    %39 = arith.addf %32, %38 : vector<3x5x12xf32>
    %40 = vector.shape_cast %5 : vector<1x12xf32> to vector<1x1x12xf32>
    %41 = vector.broadcast %40 : vector<1x1x12xf32> to vector<3x5x12xf32>
    %42 = arith.addf %39, %41 : vector<3x5x12xf32>
    %43 = vector.extract_strided_slice %42 {offsets = [0, 0, 0], sizes = [3, 5, 4], strides = [1, 1, 1]} : vector<3x5x12xf32> to vector<3x5x4xf32>
    %44 = vector.extract_strided_slice %42 {offsets = [0, 0, 4], sizes = [3, 5, 4], strides = [1, 1, 1]} : vector<3x5x12xf32> to vector<3x5x4xf32>
    %45 = vector.extract_strided_slice %42 {offsets = [0, 0, 8], sizes = [3, 5, 4], strides = [1, 1, 1]} : vector<3x5x12xf32> to vector<3x5x4xf32>
    %46 = vector.extract_strided_slice %44 {offsets = [0, 0, 0], sizes = [1, 5, 4], strides = [1, 1, 1]} : vector<3x5x4xf32> to vector<1x5x4xf32>
    %47 = vector.broadcast %46 : vector<1x5x4xf32> to vector<3x5x4xf32>
    %48 = arith.mulf %43, %47 : vector<3x5x4xf32>
    %49 = vector.extract_strided_slice %44 {offsets = [1, 0, 0], sizes = [1, 5, 4], strides = [1, 1, 1]} : vector<3x5x4xf32> to vector<1x5x4xf32>
    %50 = vector.broadcast %49 : vector<1x5x4xf32> to vector<3x5x4xf32>
    %51 = arith.mulf %43, %50 : vector<3x5x4xf32>
    %52 = vector.extract_strided_slice %44 {offsets = [2, 0, 0], sizes = [1, 5, 4], strides = [1, 1, 1]} : vector<3x5x4xf32> to vector<1x5x4xf32>
    %53 = vector.broadcast %52 : vector<1x5x4xf32> to vector<3x5x4xf32>
    %54 = arith.mulf %43, %53 : vector<3x5x4xf32>
    %55 = arith.maximumf %48, %51 : vector<3x5x4xf32>
    %56 = arith.maximumf %55, %54 : vector<3x5x4xf32>
    %57 = arith.subf %48, %56 : vector<3x5x4xf32>
    %58 = math.exp %57 : vector<3x5x4xf32>
    %59 = arith.subf %51, %56 : vector<3x5x4xf32>
    %60 = math.exp %59 : vector<3x5x4xf32>
    %61 = arith.subf %54, %56 : vector<3x5x4xf32>
    %62 = math.exp %61 : vector<3x5x4xf32>
    %63 = vector.extract_strided_slice %45 {offsets = [0, 0, 0], sizes = [1, 5, 4], strides = [1, 1, 1]} : vector<3x5x4xf32> to vector<1x5x4xf32>
    %64 = vector.broadcast %63 : vector<1x5x4xf32> to vector<3x5x4xf32>
    %65 = arith.mulf %58, %64 : vector<3x5x4xf32>
    %66 = arith.addf %58, %60 : vector<3x5x4xf32>
    %67 = vector.extract_strided_slice %45 {offsets = [1, 0, 0], sizes = [1, 5, 4], strides = [1, 1, 1]} : vector<3x5x4xf32> to vector<1x5x4xf32>
    %68 = vector.broadcast %67 : vector<1x5x4xf32> to vector<3x5x4xf32>
    %69 = arith.mulf %60, %68 : vector<3x5x4xf32>
    %70 = arith.addf %65, %69 : vector<3x5x4xf32>
    %71 = arith.addf %66, %62 : vector<3x5x4xf32>
    %72 = vector.extract_strided_slice %45 {offsets = [2, 0, 0], sizes = [1, 5, 4], strides = [1, 1, 1]} : vector<3x5x4xf32> to vector<1x5x4xf32>
    %73 = vector.broadcast %72 : vector<1x5x4xf32> to vector<3x5x4xf32>
    %74 = arith.mulf %62, %73 : vector<3x5x4xf32>
    %75 = arith.addf %70, %74 : vector<3x5x4xf32>
    %76 = tpu.reciprocal %71 {approx = true} : vector<3x5x4xf32> -> vector<3x5x4xf32>
    %77 = arith.mulf %71, %76 : vector<3x5x4xf32>
    %cst = arith.constant 2.000000e+00 : f32
    %78 = vector.broadcast %cst : f32 to vector<3x5x4xf32>
    %79 = arith.subf %78, %77 : vector<3x5x4xf32>
    %80 = arith.mulf %76, %79 : vector<3x5x4xf32>
    %81 = arith.mulf %75, %80 : vector<3x5x4xf32>
    %82 = vector.extract_strided_slice %81 {offsets = [0, 0, 0], sizes = [3, 5, 1], strides = [1, 1, 1]} : vector<3x5x4xf32> to vector<3x5x1xf32>
    %83 = vector.extract_strided_slice %2 {offsets = [0, 0], sizes = [1, 4], strides = [1, 1]} : vector<4x4xf32> to vector<1x4xf32>
    %84 = vector.shape_cast %83 : vector<1x4xf32> to vector<1x1x4xf32>
    %85 = vector.broadcast %82 : vector<3x5x1xf32> to vector<3x5x4xf32>
    %86 = vector.broadcast %84 : vector<1x1x4xf32> to vector<3x5x4xf32>
    %87 = arith.mulf %85, %86 : vector<3x5x4xf32>
    %88 = vector.extract_strided_slice %81 {offsets = [0, 0, 1], sizes = [3, 5, 1], strides = [1, 1, 1]} : vector<3x5x4xf32> to vector<3x5x1xf32>
    %89 = vector.extract_strided_slice %2 {offsets = [1, 0], sizes = [1, 4], strides = [1, 1]} : vector<4x4xf32> to vector<1x4xf32>
    %90 = vector.shape_cast %89 : vector<1x4xf32> to vector<1x1x4xf32>
    %91 = vector.broadcast %88 : vector<3x5x1xf32> to vector<3x5x4xf32>
    %92 = vector.broadcast %90 : vector<1x1x4xf32> to vector<3x5x4xf32>
    %93 = arith.mulf %91, %92 : vector<3x5x4xf32>
    %94 = arith.addf %87, %93 : vector<3x5x4xf32>
    %95 = vector.extract_strided_slice %81 {offsets = [0, 0, 2], sizes = [3, 5, 1], strides = [1, 1, 1]} : vector<3x5x4xf32> to vector<3x5x1xf32>
    %96 = vector.extract_strided_slice %2 {offsets = [2, 0], sizes = [1, 4], strides = [1, 1]} : vector<4x4xf32> to vector<1x4xf32>
    %97 = vector.shape_cast %96 : vector<1x4xf32> to vector<1x1x4xf32>
    %98 = vector.broadcast %95 : vector<3x5x1xf32> to vector<3x5x4xf32>
    %99 = vector.broadcast %97 : vector<1x1x4xf32> to vector<3x5x4xf32>
    %100 = arith.mulf %98, %99 : vector<3x5x4xf32>
    %101 = arith.addf %94, %100 : vector<3x5x4xf32>
    %102 = vector.extract_strided_slice %81 {offsets = [0, 0, 3], sizes = [3, 5, 1], strides = [1, 1, 1]} : vector<3x5x4xf32> to vector<3x5x1xf32>
    %103 = vector.extract_strided_slice %2 {offsets = [3, 0], sizes = [1, 4], strides = [1, 1]} : vector<4x4xf32> to vector<1x4xf32>
    %104 = vector.shape_cast %103 : vector<1x4xf32> to vector<1x1x4xf32>
    %105 = vector.broadcast %102 : vector<3x5x1xf32> to vector<3x5x4xf32>
    %106 = vector.broadcast %104 : vector<1x1x4xf32> to vector<3x5x4xf32>
    %107 = arith.mulf %105, %106 : vector<3x5x4xf32>
    %108 = arith.addf %101, %107 : vector<3x5x4xf32>
    %109 = vector.shape_cast %6 : vector<1x4xf32> to vector<1x1x4xf32>
    %110 = vector.broadcast %109 : vector<1x1x4xf32> to vector<3x5x4xf32>
    %111 = arith.addf %108, %110 : vector<3x5x4xf32>
    %112 = arith.addf %0, %111 : vector<3x5x4xf32>
    %cst_18 = arith.constant dense<0.000000e+00> : vector<3x5xf32>
    %113 = vector.multi_reduction <add>, %112, %cst_18 [2] : vector<3x5x4xf32> to vector<3x5xf32>
    %114 = vector.shape_cast %113 : vector<3x5xf32> to vector<3x5x1xf32>
    %cst_19 = arith.constant 4.000000e+00 : f32
    %115 = vector.broadcast %cst_19 : f32 to vector<3x5x1xf32>
    %116 = arith.divf %114, %115 : vector<3x5x1xf32>
    %117 = vector.broadcast %116 : vector<3x5x1xf32> to vector<3x5x4xf32>
    %118 = arith.subf %112, %117 : vector<3x5x4xf32>
    %119 = arith.mulf %118, %118 : vector<3x5x4xf32>
    %cst_20 = arith.constant dense<0.000000e+00> : vector<3x5xf32>
    %120 = vector.multi_reduction <add>, %119, %cst_20 [2] : vector<3x5x4xf32> to vector<3x5xf32>
    %121 = vector.shape_cast %120 : vector<3x5xf32> to vector<3x5x1xf32>
    %cst_21 = arith.constant 4.000000e+00 : f32
    %122 = vector.broadcast %cst_21 : f32 to vector<3x5x1xf32>
    %123 = arith.divf %121, %122 : vector<3x5x1xf32>
    %cst_22 = arith.constant 9.99999974E-6 : f32
    %124 = vector.broadcast %cst_22 : f32 to vector<3x5x1xf32>
    %125 = arith.addf %123, %124 : vector<3x5x1xf32>
    %126 = math.rsqrt %125 : vector<3x5x1xf32>
    %127 = vector.broadcast %126 : vector<3x5x1xf32> to vector<3x5x4xf32>
    %128 = arith.mulf %118, %127 : vector<3x5x4xf32>
    %129 = vector.shape_cast %9 : vector<1x4xf32> to vector<1x1x4xf32>
    %130 = vector.broadcast %129 : vector<1x1x4xf32> to vector<3x5x4xf32>
    %131 = arith.mulf %128, %130 : vector<3x5x4xf32>
    %132 = vector.shape_cast %10 : vector<1x4xf32> to vector<1x1x4xf32>
    %133 = vector.broadcast %132 : vector<1x1x4xf32> to vector<3x5x4xf32>
    %134 = arith.addf %131, %133 : vector<3x5x4xf32>
    %135 = vector.extract_strided_slice %134 {offsets = [0, 0, 0], sizes = [3, 5, 1], strides = [1, 1, 1]} : vector<3x5x4xf32> to vector<3x5x1xf32>
    %136 = vector.extract_strided_slice %3 {offsets = [0, 0], sizes = [1, 4], strides = [1, 1]} : vector<4x4xf32> to vector<1x4xf32>
    %137 = vector.shape_cast %136 : vector<1x4xf32> to vector<1x1x4xf32>
    %138 = vector.broadcast %135 : vector<3x5x1xf32> to vector<3x5x4xf32>
    %139 = vector.broadcast %137 : vector<1x1x4xf32> to vector<3x5x4xf32>
    %140 = arith.mulf %138, %139 : vector<3x5x4xf32>
    %141 = vector.extract_strided_slice %134 {offsets = [0, 0, 1], sizes = [3, 5, 1], strides = [1, 1, 1]} : vector<3x5x4xf32> to vector<3x5x1xf32>
    %142 = vector.extract_strided_slice %3 {offsets = [1, 0], sizes = [1, 4], strides = [1, 1]} : vector<4x4xf32> to vector<1x4xf32>
    %143 = vector.shape_cast %142 : vector<1x4xf32> to vector<1x1x4xf32>
    %144 = vector.broadcast %141 : vector<3x5x1xf32> to vector<3x5x4xf32>
    %145 = vector.broadcast %143 : vector<1x1x4xf32> to vector<3x5x4xf32>
    %146 = arith.mulf %144, %145 : vector<3x5x4xf32>
    %147 = arith.addf %140, %146 : vector<3x5x4xf32>
    %148 = vector.extract_strided_slice %134 {offsets = [0, 0, 2], sizes = [3, 5, 1], strides = [1, 1, 1]} : vector<3x5x4xf32> to vector<3x5x1xf32>
    %149 = vector.extract_strided_slice %3 {offsets = [2, 0], sizes = [1, 4], strides = [1, 1]} : vector<4x4xf32> to vector<1x4xf32>
    %150 = vector.shape_cast %149 : vector<1x4xf32> to vector<1x1x4xf32>
    %151 = vector.broadcast %148 : vector<3x5x1xf32> to vector<3x5x4xf32>
    %152 = vector.broadcast %150 : vector<1x1x4xf32> to vector<3x5x4xf32>
    %153 = arith.mulf %151, %152 : vector<3x5x4xf32>
    %154 = arith.addf %147, %153 : vector<3x5x4xf32>
    %155 = vector.extract_strided_slice %134 {offsets = [0, 0, 3], sizes = [3, 5, 1], strides = [1, 1, 1]} : vector<3x5x4xf32> to vector<3x5x1xf32>
    %156 = vector.extract_strided_slice %3 {offsets = [3, 0], sizes = [1, 4], strides = [1, 1]} : vector<4x4xf32> to vector<1x4xf32>
    %157 = vector.shape_cast %156 : vector<1x4xf32> to vector<1x1x4xf32>
    %158 = vector.broadcast %155 : vector<3x5x1xf32> to vector<3x5x4xf32>
    %159 = vector.broadcast %157 : vector<1x1x4xf32> to vector<3x5x4xf32>
    %160 = arith.mulf %158, %159 : vector<3x5x4xf32>
    %161 = arith.addf %154, %160 : vector<3x5x4xf32>
    %162 = vector.shape_cast %7 : vector<1x4xf32> to vector<1x1x4xf32>
    %163 = vector.broadcast %162 : vector<1x1x4xf32> to vector<3x5x4xf32>
    %164 = arith.addf %161, %163 : vector<3x5x4xf32>
    %cst_23 = arith.constant 0.000000e+00 : f32
    %165 = vector.broadcast %cst_23 : f32 to vector<3x5x4xf32>
    %166 = arith.maximumf %164, %165 : vector<3x5x4xf32>
    %167 = vector.extract_strided_slice %166 {offsets = [0, 0, 0], sizes = [3, 5, 1], strides = [1, 1, 1]} : vector<3x5x4xf32> to vector<3x5x1xf32>
    %168 = vector.extract_strided_slice %4 {offsets = [0, 0], sizes = [1, 4], strides = [1, 1]} : vector<4x4xf32> to vector<1x4xf32>
    %169 = vector.shape_cast %168 : vector<1x4xf32> to vector<1x1x4xf32>
    %170 = vector.broadcast %167 : vector<3x5x1xf32> to vector<3x5x4xf32>
    %171 = vector.broadcast %169 : vector<1x1x4xf32> to vector<3x5x4xf32>
    %172 = arith.mulf %170, %171 : vector<3x5x4xf32>
    %173 = vector.extract_strided_slice %166 {offsets = [0, 0, 1], sizes = [3, 5, 1], strides = [1, 1, 1]} : vector<3x5x4xf32> to vector<3x5x1xf32>
    %174 = vector.extract_strided_slice %4 {offsets = [1, 0], sizes = [1, 4], strides = [1, 1]} : vector<4x4xf32> to vector<1x4xf32>
    %175 = vector.shape_cast %174 : vector<1x4xf32> to vector<1x1x4xf32>
    %176 = vector.broadcast %173 : vector<3x5x1xf32> to vector<3x5x4xf32>
    %177 = vector.broadcast %175 : vector<1x1x4xf32> to vector<3x5x4xf32>
    %178 = arith.mulf %176, %177 : vector<3x5x4xf32>
    %179 = arith.addf %172, %178 : vector<3x5x4xf32>
    %180 = vector.extract_strided_slice %166 {offsets = [0, 0, 2], sizes = [3, 5, 1], strides = [1, 1, 1]} : vector<3x5x4xf32> to vector<3x5x1xf32>
    %181 = vector.extract_strided_slice %4 {offsets = [2, 0], sizes = [1, 4], strides = [1, 1]} : vector<4x4xf32> to vector<1x4xf32>
    %182 = vector.shape_cast %181 : vector<1x4xf32> to vector<1x1x4xf32>
    %183 = vector.broadcast %180 : vector<3x5x1xf32> to vector<3x5x4xf32>
    %184 = vector.broadcast %182 : vector<1x1x4xf32> to vector<3x5x4xf32>
    %185 = arith.mulf %183, %184 : vector<3x5x4xf32>
    %186 = arith.addf %179, %185 : vector<3x5x4xf32>
    %187 = vector.extract_strided_slice %166 {offsets = [0, 0, 3], sizes = [3, 5, 1], strides = [1, 1, 1]} : vector<3x5x4xf32> to vector<3x5x1xf32>
    %188 = vector.extract_strided_slice %4 {offsets = [3, 0], sizes = [1, 4], strides = [1, 1]} : vector<4x4xf32> to vector<1x4xf32>
    %189 = vector.shape_cast %188 : vector<1x4xf32> to vector<1x1x4xf32>
    %190 = vector.broadcast %187 : vector<3x5x1xf32> to vector<3x5x4xf32>
    %191 = vector.broadcast %189 : vector<1x1x4xf32> to vector<3x5x4xf32>
    %192 = arith.mulf %190, %191 : vector<3x5x4xf32>
    %193 = arith.addf %186, %192 : vector<3x5x4xf32>
    %194 = vector.shape_cast %8 : vector<1x4xf32> to vector<1x1x4xf32>
    %195 = vector.broadcast %194 : vector<1x1x4xf32> to vector<3x5x4xf32>
    %196 = arith.addf %193, %195 : vector<3x5x4xf32>
    %197 = arith.addf %134, %196 : vector<3x5x4xf32>
    %cst_24 = arith.constant dense<0.000000e+00> : vector<3x5xf32>
    %198 = vector.multi_reduction <add>, %197, %cst_24 [2] : vector<3x5x4xf32> to vector<3x5xf32>
    %199 = vector.shape_cast %198 : vector<3x5xf32> to vector<3x5x1xf32>
    %cst_25 = arith.constant 4.000000e+00 : f32
    %200 = vector.broadcast %cst_25 : f32 to vector<3x5x1xf32>
    %201 = arith.divf %199, %200 : vector<3x5x1xf32>
    %202 = vector.broadcast %201 : vector<3x5x1xf32> to vector<3x5x4xf32>
    %203 = arith.subf %197, %202 : vector<3x5x4xf32>
    %204 = arith.mulf %203, %203 : vector<3x5x4xf32>
    %cst_26 = arith.constant dense<0.000000e+00> : vector<3x5xf32>
    %205 = vector.multi_reduction <add>, %204, %cst_26 [2] : vector<3x5x4xf32> to vector<3x5xf32>
    %206 = vector.shape_cast %205 : vector<3x5xf32> to vector<3x5x1xf32>
    %cst_27 = arith.constant 4.000000e+00 : f32
    %207 = vector.broadcast %cst_27 : f32 to vector<3x5x1xf32>
    %208 = arith.divf %206, %207 : vector<3x5x1xf32>
    %cst_28 = arith.constant 9.99999974E-6 : f32
    %209 = vector.broadcast %cst_28 : f32 to vector<3x5x1xf32>
    %210 = arith.addf %208, %209 : vector<3x5x1xf32>
    %211 = math.rsqrt %210 : vector<3x5x1xf32>
    %212 = vector.broadcast %211 : vector<3x5x1xf32> to vector<3x5x4xf32>
    %213 = arith.mulf %203, %212 : vector<3x5x4xf32>
    %214 = vector.shape_cast %11 : vector<1x4xf32> to vector<1x1x4xf32>
    %215 = vector.broadcast %214 : vector<1x1x4xf32> to vector<3x5x4xf32>
    %216 = arith.mulf %213, %215 : vector<3x5x4xf32>
    %217 = vector.shape_cast %12 : vector<1x4xf32> to vector<1x1x4xf32>
    %218 = vector.broadcast %217 : vector<1x1x4xf32> to vector<3x5x4xf32>
    %219 = arith.addf %216, %218 : vector<3x5x4xf32>
    %c0_29 = arith.constant 0 : index
    %c0_30 = arith.constant 0 : index
    %c0_31 = arith.constant 0 : index
    %220 = vector.load %arg2[%c0_29, %c0_30, %c0_31] : memref<3x5x4xf32, #tpu.memory_space<vmem>>, vector<3x5x4xf32>
    tpu.vector_store %arg2[%c0_29, %c0_30, %c0_31], %219 {strides = array<i32>} : memref<3x5x4xf32, #tpu.memory_space<vmem>>, vector<3x5x4xf32>,
    return
  }
}

</mosaic_0001>

<bundles_post_ra>
// kernel: transformer_encoder_layer.1
= control target key start
LH: loop header
LB: loop body
LE: loop exit
PB: predicated region body
PF: predicated region fallthrough
CT: control target
= control target key end

     0   :  { %v663_v0 = vmov 1   ;;  %v664_v1 = vmov 0   ;;  %v665_v5 = vmov 2   ;;  %v666_v6 = vmov 3   ;;  %s667_s18 = smov 124   ;;  %s669_s19 = smov 116   ;;  %s871_s0 = inlined_call_operand.vmem [shape: f32[3,5,4], index: 0, kind: input, shape index: {}]   ;;  %s872_s1 = inlined_call_operand.vmem [shape: f32[8,128], index: 1, kind: input, shape index: {}]   ;;  %s873_s2 = inlined_call_operand.vmem [shape: f32[3,5,4], index: 2, kind: output, shape index: {}]  }
   0x1   :  { %598 = vset.pattern.permute.xlu1 %v663_v0  ;;  %597 = vset.pattern.permute.xlu0 %v664_v1  ;;  %v699_v2 = vld [vmem:[%s871_s0] sm:$0x1f]  ;;  %v706_v3 = vld [vmem:[%s871_s0 + $0x8] sm:$0x1f]  ;;  %v713_v4 = vld [vmem:[%s871_s0 + $0x10] sm:$0x1f]  ;;  %v31_v7 = vlaneseq }
   0x2   :  { %39 = vperm.xlu1 %598, %v699_v2   ;;  %18 = vperm.xlu0 %597, %v699_v2   ;;  %v14_v15 = vld [vmem:[%s872_s1] sm:$0xf]  ;;  %v750_v37 = vld [vmem:[%s872_s1 + $0x4] ss:$0 sm:$0xff]  ;;  %s668_s1 = smov 120   ;;  %vm300_vm0 = vcmask 28672  }
   0x3   :  { %v32_v10 = vshrl.u32 %v31_v7, 7  ;;  %s670_s20 = smov 100   ;;  %s671_s21 = smov 104  }
   0x4   :  { %s676_s22 = smov 108   ;;  %s677_s23 = smov 96  }
   0x5   :  { %v52_v13 = vsub.s32 1, %v32_v10  ;;  %v33_v14 = vsub.s32 0, %v32_v10  ;;  %v74_v16 = vsub.s32 2, %v32_v10  ;;  %v96_v22 = vsub.s32 3, %v32_v10  ;;  %s678_s24 = smov 92  }
   0x6   :  { %43 = vperm.xlu1 %598, %v706_v3   ;;  %23 = vperm.xlu0 %597, %v706_v3  }
   0x7   :  { %v732_v19 = vrot.slane %v14_v15, %v52_v13  ;;  %v734_v20 = vrot.slane %v14_v15, %v33_v14  ;;  %v736_v21 = vrot.slane %v14_v15, %v74_v16  ;;  %v741_v28 = vrot.slane %v14_v15, %v96_v22 }
   0xa   :  { %47 = vperm.xlu1 %598, %v713_v4   ;;  %28 = vperm.xlu0 %597, %v713_v4  }
   0xe   :  { %600 = vset.pattern.permute.xlu1 %v665_v5  ;;  %599 = vset.pattern.permute.xlu0 %v665_v5 }
   0xf   :  { %65 = vperm.xlu1 %600, %v706_v3   ;;  %61 = vperm.xlu0 %599, %v699_v2  }
  0x13   :  { %69 = vperm.xlu1 %600, %v713_v4   ;;  %601 = vset.pattern.permute.xlu0 %v666_v6 }
  0x14   :  { %83 = vperm.xlu0 %601, %v699_v2  }
  0x17   :  { %602 = vset.pattern.permute.xlu1 %v666_v6 }
  0x18   :  { %87 = vperm.xlu1 %602, %v706_v3   ;;  %603 = vset.pattern.permute.xlu0 %v664_v1 }
  0x1c   :  { %91 = vperm.xlu1 %602, %v713_v4  }
  0x20   :  { %604 = vset.pattern.permute.xlu1 %v664_v1 }
  0x81   :  { %v40_v8 = vpop.permute.xlu1 %39  ;;  %v19_v9 = vpop.permute.xlu0 %18 }
  0x82   :  { %v54_v23 = vmul.f32 %v732_v19, %v40_v8  ;;  %v35_v24 = vmul.f32 %v734_v20, %v19_v9 }
  0x84   :  { %v57_v29 = vadd.f32 %v54_v23, %v35_v24 }
  0x85   :  { %v44_v11 = vpop.permute.xlu1 %43  ;;  %v24_v12 = vpop.permute.xlu0 %23 }
  0x86   :  { %v55_v30 = vmul.f32 %v732_v19, %v44_v11  ;;  %v36_v31 = vmul.f32 %v734_v20, %v24_v12 }
  0x88   :  { %v58_v38 = vadd.f32 %v55_v30, %v36_v31 }
  0x89   :  { %v48_v17 = vpop.permute.xlu1 %47  ;;  %v29_v18 = vpop.permute.xlu0 %28 }
  0x8a   :  { %v56_v39 = vmul.f32 %v732_v19, %v48_v17  ;;  %v37_v40 = vmul.f32 %v734_v20, %v29_v18 }
  0x8c   :  { %v59_v47 = vadd.f32 %v56_v39, %v37_v40 }
  0x8e   :  { %v66_v25 = vpop.permute.xlu1 %65  ;;  %v62_v26 = vpop.permute.xlu0 %61 }
  0x8f   :  { %v76_v27 = vmul.f32 %v736_v21, %v62_v26  ;;  %v77_v34 = vmul.f32 %v736_v21, %v66_v25 }
  0x91   :  { %v79_v35 = vadd.f32 %v76_v27, %v57_v29  ;;  %v80_v43 = vadd.f32 %v77_v34, %v58_v38 }
  0x92   :  { %v70_v32 = vpop.permute.xlu1 %69 }
  0x93   :  { %v84_v33 = vpop.permute.xlu0 %83  ;;  %v78_v44 = vmul.f32 %v736_v21, %v70_v32 }
  0x94   :  { %v98_v36 = vmul.f32 %v741_v28, %v84_v33 }
  0x95   :  { %v81_v50 = vadd.f32 %v78_v44, %v59_v47 }
  0x96   :  { %v101_v41 = vadd.f32 %v98_v36, %v79_v35 }
  0x97   :  { %v88_v42 = vpop.permute.xlu1 %87 }
  0x98   :  { %v108_v45 = vadd.f32 %v750_v37, %v101_v41  ;;  %v99_v46 = vmul.f32 %v741_v28, %v88_v42 }
  0x9a   :  { %v102_v48 = vadd.f32 %v99_v46, %v80_v43  ;;  %112 = vrot.lane.b32.xlu0 %v108_v45, %s667_s18 }
  0x9b   :  { %v92_v49 = vpop.permute.xlu1 %91 }
  0x9c   :  { %v109_v51 = vadd.f32 %v750_v37, %v102_v48  ;;  %v100_v52 = vmul.f32 %v741_v28, %v92_v49 }
  0x9e   :  { %v103_v53 = vadd.f32 %v100_v52, %v81_v50  ;;  %119 = vrot.lane.b32.xlu1 %v109_v51, %s667_s18 }
  0xa0   :  { %v110_v54 = vadd.f32 %v750_v37, %v103_v53 }
  0xa2   :  { %165 = vrot.lane.b32.xlu1 %v108_v45, %s668_s1  ;;  %126 = vrot.lane.b32.xlu0 %v110_v54, %s667_s18 }
  0xa6   :  { %186 = vrot.lane.b32.xlu1 %v110_v54, %s668_s1  ;;  %174 = vrot.lane.b32.xlu0 %v109_v51, %s668_s1 }
 0x10c   :  { %v113_v55 = vpop.permute.xlu0 %112 }
 0x10d   :  { %v115_v60 = vmul.f32 %v113_v55, %v108_v45  ;;  %v116_v61 = vmul.f32 %v113_v55, %v109_v51  ;;  %v117_v62 = vmul.f32 %v113_v55, %v110_v54 }
 0x110   :  { %v120_v56 = vpop.permute.xlu1 %119 }
 0x111   :  { %v122_v57 = vmul.f32 %v120_v56, %v108_v45  ;;  %v123_v58 = vmul.f32 %v120_v56, %v109_v51  ;;  %v124_v59 = vmul.f32 %v120_v56, %v110_v54 }
 0x113   :  { %v132_v63 = vmax.f32 %v115_v60, %v122_v57  ;;  %v133_v7 = vmax.f32 %v116_v61, %v123_v58  ;;  %v134_v9 = vmax.f32 %v117_v62, %v124_v59 }
 0x114   :  { %v127_v8 = vpop.permute.xlu0 %126 }
 0x115   :  { %v129_v10 = vmul.f32 %v127_v8, %v108_v45  ;;  %v130_v11 = vmul.f32 %v127_v8, %v109_v51  ;;  %v131_v12 = vmul.f32 %v127_v8, %v110_v54  ;;  %v166_v54 = vpop.permute.xlu1 %165 }
 0x117   :  { %v135_v13 = vmax.f32 %v132_v63, %v129_v10  ;;  %v136_v14 = vmax.f32 %v133_v7, %v130_v11  ;;  %v137_v15 = vmax.f32 %v134_v9, %v131_v12 }
 0x118   :  { %v175_v55 = vpop.permute.xlu0 %174 }
 0x119   :  { %v138_v16 = vsub.f32 %v115_v60, %v135_v13  ;;  %v139_v17 = vsub.f32 %v116_v61, %v136_v14  ;;  %v140_v18 = vsub.f32 %v117_v62, %v137_v15  ;;  %v147_v22 = vsub.f32 %v122_v57, %v135_v13  ;;  %v187_v8 = vpop.permute.xlu1 %186 }
 0x11a   :  { %v148_v23 = vsub.f32 %v123_v58, %v136_v14  ;;  %v149_v24 = vsub.f32 %v124_v59, %v137_v15  ;;  %v156_v29 = vsub.f32 %v129_v10, %v135_v13  ;;  %v157_v31 = vsub.f32 %v130_v11, %v136_v14 }
 0x11b   :  { %v141_v25 = vmul.f32 1.442695, %v138_v16  ;;  %v143_v26 = vmul.f32 1.442695, %v139_v17  ;;  %v145_v27 = vmul.f32 1.442695, %v140_v18  ;;  %v158_v33 = vsub.f32 %v131_v12, %v137_v15 }
 0x11c   :  { %v150_v30 = vmul.f32 1.442695, %v147_v22  ;;  %v152_v32 = vmul.f32 1.442695, %v148_v23  ;;  %v154_v34 = vmul.f32 1.442695, %v149_v24 }
 0x11d   :  { %627 = vpow2.f32 %v141_v25  ;;  %v159_v35 = vmul.f32 1.442695, %v156_v29  ;;  %v161_v36 = vmul.f32 1.442695, %v157_v31  ;;  %v163_v38 = vmul.f32 1.442695, %v158_v33 }
 0x11e   :  { %629 = vpow2.f32 %v143_v26 }
 0x11f   :  { %631 = vpow2.f32 %v145_v27 }
 0x120   :  { %633 = vpow2.f32 %v150_v30 }
 0x121   :  { %635 = vpow2.f32 %v152_v32 }
 0x122   :  { %637 = vpow2.f32 %v154_v34 }
 0x123   :  { %639 = vpow2.f32 %v159_v35 }
 0x124   :  { %641 = vpow2.f32 %v161_v36 }
 0x125   :  { %643 = vpow2.f32 %v163_v38 }
 0x127   :  { %v628_v39 = vpop.eup %627 }
 0x128   :  { %v630_v40 = vpop.eup %629  ;;  %v168_v56 = vmul.f32 %v628_v39, %v166_v54 }
 0x129   :  { %v632_v41 = vpop.eup %631  ;;  %v169_v58 = vmul.f32 %v630_v40, %v166_v54 }
 0x12a   :  { %v634_v42 = vpop.eup %633  ;;  %v170_v9 = vmul.f32 %v632_v41, %v166_v54 }
 0x12b   :  { %v636_v43 = vpop.eup %635  ;;  %v171_v44 = vadd.f32 %v634_v42, %v628_v39  ;;  %v177_v57 = vmul.f32 %v634_v42, %v175_v55 }
 0x12c   :  { %v638_v45 = vpop.eup %637  ;;  %v172_v46 = vadd.f32 %v636_v43, %v630_v40  ;;  %v178_v59 = vmul.f32 %v636_v43, %v175_v55 }
 0x12d   :  { %v640_v47 = vpop.eup %639  ;;  %v173_v48 = vadd.f32 %v638_v45, %v632_v41  ;;  %v180_v62 = vadd.f32 %v177_v57, %v168_v56  ;;  %v179_v10 = vmul.f32 %v638_v45, %v175_v55 }
 0x12e   :  { %v642_v49 = vpop.eup %641  ;;  %v183_v50 = vadd.f32 %v640_v47, %v171_v44  ;;  %v181_v11 = vadd.f32 %v178_v59, %v169_v58  ;;  %v189_v13 = vmul.f32 %v640_v47, %v187_v8 }
 0x12f   :  { %v644_v51 = vpop.eup %643  ;;  %v184_v52 = vadd.f32 %v642_v49, %v172_v46  ;;  %v190_v16 = vmul.f32 %v642_v49, %v187_v8  ;;  %v182_v24 = vadd.f32 %v179_v10, %v170_v9 }
 0x130   :  { %645 = vrcp.f32 %v183_v50  ;;  %v185_v53 = vadd.f32 %v644_v51, %v173_v48  ;;  %v192_v18 = vadd.f32 %v189_v13, %v180_v62  ;;  %v191_v29 = vmul.f32 %v644_v51, %v187_v8 }
 0x131   :  { %647 = vrcp.f32 %v184_v52  ;;  %v193_v25 = vadd.f32 %v190_v16, %v181_v11 }
 0x132   :  { %649 = vrcp.f32 %v185_v53  ;;  %v194_v32 = vadd.f32 %v191_v29, %v182_v24 }
 0x13a   :  { %v646_v60 = vpop.eup %645 }
 0x13b   :  { %v648_v61 = vpop.eup %647  ;;  %v198_v63 = vmul.f32 %v646_v60, %v183_v50 }
 0x13c   :  { %v650_v7 = vpop.eup %649  ;;  %v199_v12 = vmul.f32 %v648_v61, %v184_v52 }
 0x13d   :  { %v201_v14 = vsub.f32 2.0, %v198_v63  ;;  %v200_v15 = vmul.f32 %v650_v7, %v185_v53 }
 0x13e   :  { %v202_v17 = vsub.f32 2.0, %v199_v12 }
 0x13f   :  { %v204_v22 = vmul.f32 %v646_v60, %v201_v14  ;;  %v203_v23 = vsub.f32 2.0, %v200_v15 }
 0x140   :  { %v205_v26 = vmul.f32 %v648_v61, %v202_v17 }
 0x141   :  { %v207_v27 = vmul.f32 %v204_v22, %v192_v18  ;;  %v206_v31 = vmul.f32 %v650_v7, %v203_v23 }
 0x142   :  { %v208_v30 = vmul.f32 %v205_v26, %v193_v25 }
 0x143   :  { %212 = vperm.xlu0 %603, %v207_v27   ;;  %v209_v33 = vmul.f32 %v206_v31, %v194_v32 }
 0x144   :  { %217 = vperm.xlu1 %604, %v208_v30  }
 0x147   :  { %605 = vset.pattern.permute.xlu0 %v663_v0 }
 0x148   :  { %222 = vperm.xlu1 %604, %v209_v33   ;;  %229 = vperm.xlu0 %605, %v207_v27  }
 0x14c   :  { %606 = vset.pattern.permute.xlu1 %v663_v0  ;;  %607 = vset.pattern.permute.xlu0 %v665_v5 }
 0x14d   :  { %233 = vperm.xlu1 %606, %v208_v30   ;;  %247 = vperm.xlu0 %607, %v207_v27  }
 0x151   :  { %237 = vperm.xlu1 %606, %v209_v33   ;;  %609 = vset.pattern.permute.xlu0 %v666_v6 }
 0x152   :  { %265 = vperm.xlu0 %609, %v207_v27  }
 0x155   :  { %608 = vset.pattern.permute.xlu1 %v665_v5 }
 0x156   :  { %251 = vperm.xlu1 %608, %v208_v30   ;;  %612 = vset.pattern.permute.xlu0 %v664_v1 }
 0x15a   :  { %255 = vperm.xlu1 %608, %v209_v33  }
 0x15e   :  { %610 = vset.pattern.permute.xlu1 %v666_v6 }
 0x15f   :  { %269 = vperm.xlu1 %610, %v208_v30  }
 0x163   :  { %273 = vperm.xlu1 %610, %v209_v33  }
 0x167   :  { %611 = vset.pattern.permute.xlu1 %v664_v1 }
 0x1c2   :  { %v213_v34 = vpop.permute.xlu0 %212 }
 0x1c3   :  { %v218_v35 = vpop.permute.xlu1 %217  ;;  %v225_v42 = vmul.f32 %v213_v34, %v734_v20 }
 0x1c4   :  { %v226_v53 = vmul.f32 %v218_v35, %v734_v20 }
 0x1c7   :  { %v223_v36 = vpop.permute.xlu1 %222  ;;  %v230_v38 = vpop.permute.xlu0 %229 }
 0x1c8   :  { %v240_v39 = vmul.f32 %v230_v38, %v732_v19  ;;  %v227_v58 = vmul.f32 %v223_v36, %v734_v20 }
 0x1ca   :  { %v243_v44 = vadd.f32 %v240_v39, %v225_v42 }
 0x1cc   :  { %v234_v40 = vpop.permute.xlu1 %233  ;;  %v248_v41 = vpop.permute.xlu0 %247 }
 0x1cd   :  { %v258_v43 = vmul.f32 %v248_v41, %v736_v21  ;;  %v241_v51 = vmul.f32 %v234_v40, %v732_v19 }
 0x1cf   :  { %v261_v47 = vadd.f32 %v258_v43, %v243_v44  ;;  %v244_v55 = vadd.f32 %v241_v51, %v226_v53 }
 0x1d0   :  { %v238_v45 = vpop.permute.xlu1 %237 }
 0x1d1   :  { %v266_v46 = vpop.permute.xlu0 %265  ;;  %v242_v56 = vmul.f32 %v238_v45, %v732_v19 }
 0x1d2   :  { %v276_v48 = vmul.f32 %v266_v46, %v741_v28 }
 0x1d3   :  { %v245_v62 = vadd.f32 %v242_v56, %v227_v58 }
 0x1d4   :  { %v279_v49 = vadd.f32 %v276_v48, %v261_v47 }
 0x1d5   :  { %v252_v1 = vpop.permute.xlu1 %251 }
 0x1d6   :  { %v282_v50 = vadd.f32 %v750_v37, %v279_v49  ;;  %v259_v54 = vmul.f32 %v252_v1, %v736_v21 }
 0x1d8   :  { %288 = vrot.lane.b32.xlu0 %v282_v50, %s669_s19  ;;  %v262_v59 = vadd.f32 %v259_v54, %v244_v55 }
 0x1d9   :  { %v256_v52 = vpop.permute.xlu1 %255 }
 0x1da   :  { %v260_v60 = vmul.f32 %v256_v52, %v736_v21 }
 0x1dc   :  { %v263_v8 = vadd.f32 %v260_v60, %v245_v62 }
 0x1de   :  { %v270_v57 = vpop.permute.xlu1 %269 }
 0x1df   :  { %v277_v61 = vmul.f32 %v270_v57, %v741_v28 }
 0x1e1   :  { %v280_v63 = vadd.f32 %v277_v61, %v262_v59  ;;  %v672_v61 = vmov 16  }
 0x1e2   :  { %v274_v7 = vpop.permute.xlu1 %273 }
 0x1e3   :  { %v278_v9 = vmul.f32 %v274_v7, %v741_v28  ;;  %v283_v10 = vadd.f32 %v750_v37, %v280_v63 }
 0x1e5   :  { %v281_v11 = vadd.f32 %v278_v9, %v263_v8  ;;  %290 = vrot.lane.b32.xlu1 %v283_v10, %s669_s19 }
 0x1e7   :  { %v284_v12 = vadd.f32 %v750_v37, %v281_v11 }
 0x1e9   :  { %292 = vrot.lane.b32.xlu0 %v284_v12, %s669_s19 }
 0x24a   :  { %v289_v13 = vpop.permute.xlu0 %288 }
 0x24b   :  { %v297_v14 = vadd.f32 %v289_v13, %v699_v2 }
 0x24d   :  { %v301_v15 = vsel %vm300_vm0, %v297_v14, 0.0 }
 0x24e   :  { %302 = vadd.xlane.f32.xlu1 %v301_v15 }
 0x257   :  { %v291_v16 = vpop.permute.xlu1 %290 }
 0x258   :  { %v298_v17 = vadd.f32 %v291_v16, %v706_v3 }
 0x25a   :  { %v304_v18 = vsel %vm300_vm0, %v298_v17, 0.0 }
 0x25b   :  { %305 = vadd.xlane.f32.xlu0 %v304_v18  ;;  %v293_v22 = vpop.permute.xlu0 %292 }
 0x25c   :  { %v299_v23 = vadd.f32 %v293_v22, %v713_v4 }
 0x25e   :  { %v307_v24 = vsel %vm300_vm0, %v299_v23, 0.0 }
 0x25f   :  { %308 = vadd.xlane.f32.xlu0 %v307_v24 }
 0x2db   :  { %v303_v25 = vpop.xlane.xlu1 %302 }
 0x2dc   :  { %v311_v26 = vmul.f32 0.25, %v303_v25 }
 0x2de   :  { %v314_v27 = vsub.f32 %v297_v14, %v311_v26 }
 0x2e0   :  { %v317_v29 = vmul.f32 %v314_v27, %v314_v27 }
 0x2e2   :  { %v320_v2 = vsel %vm300_vm0, %v317_v29, 0.0 }
 0x2e3   :  { %321 = vadd.xlane.f32.xlu1 %v320_v2 }
 0x2e8   :  { %v306_v30 = vpop.xlane.xlu0 %305 }
 0x2e9   :  { %v312_v31 = vmul.f32 0.25, %v306_v30 }
 0x2eb   :  { %v315_v32 = vsub.f32 %v298_v17, %v312_v31 }
 0x2ec   :  { %v309_v3 = vpop.xlane.xlu0 %308 }
 0x2ed   :  { %v313_v33 = vmul.f32 0.25, %v309_v3  ;;  %v318_v34 = vmul.f32 %v315_v32, %v315_v32 }
 0x2ef   :  { %v316_v35 = vsub.f32 %v299_v23, %v313_v33  ;;  %v323_v36 = vsel %vm300_vm0, %v318_v34, 0.0  ;;  %v673_v33 = vmov 17  }
 0x2f0   :  { %324 = vadd.xlane.f32.xlu0 %v323_v36 }
 0x2f1   :  { %v319_v4 = vmul.f32 %v316_v35, %v316_v35 }
 0x2f3   :  { %v326_v38 = vsel %vm300_vm0, %v319_v4, 0.0 }
 0x2f4   :  { %327 = vadd.xlane.f32.xlu1 %v326_v38 }
 0x305   :  { %348 = vrot.lane.b32.xlu1 %v750_v37, %s670_s20 }
 0x306   :  { %342 = vrot.lane.b32.xlu0 %v750_v37, %s671_s21 }
 0x370   :  { %v322_v39 = vpop.xlane.xlu1 %321 }
 0x371   :  { %v329_v40 = vmul.f32 0.25, %v322_v39 }
 0x373   :  { %v332_v41 = vadd.f32 1e-05, %v329_v40  ;;  %v674_v40 = vmov 18  }
 0x375   :  { %651 = vrsqrt.f32 %v332_v41 }
 0x37d   :  { %v325_v42 = vpop.xlane.xlu0 %324 }
 0x37e   :  { %v330_v43 = vmul.f32 0.25, %v325_v42 }
 0x37f   :  { %v652_v44 = vpop.eup %651 }
 0x380   :  { %v333_v45 = vadd.f32 1e-05, %v330_v43  ;;  %v338_v46 = vmul.f32 %v652_v44, %v314_v27 }
 0x381   :  { %v328_v47 = vpop.xlane.xlu1 %327  ;;  %v343_v48 = vpop.permute.xlu0 %342 }
 0x382   :  { %653 = vrsqrt.f32 %v333_v45  ;;  %v331_v49 = vmul.f32 0.25, %v328_v47  ;;  %v345_v1 = vmul.f32 %v343_v48, %v338_v46  ;;  %v675_v45 = vmov 19  }
 0x384   :  { %v334_v50 = vadd.f32 1e-05, %v331_v49 }
 0x385   :  { %v349_v51 = vpop.permute.xlu1 %348 }
 0x386   :  { %655 = vrsqrt.f32 %v334_v50  ;;  %v794_v52 = vadd.f32 %v349_v51, %v345_v1 }
 0x388   :  { %356 = vperm.xlu1 %611, %v794_v52  }
 0x38c   :  { %v654_v53 = vpop.eup %653 }
 0x38d   :  { %v339_v54 = vmul.f32 %v654_v53, %v315_v32 }
 0x38f   :  { %v346_v55 = vmul.f32 %v343_v48, %v339_v54 }
 0x390   :  { %v656_v56 = vpop.eup %655 }
 0x391   :  { %v340_v57 = vmul.f32 %v656_v56, %v316_v35  ;;  %v797_v58 = vadd.f32 %v349_v51, %v346_v55 }
 0x393   :  { %v347_v59 = vmul.f32 %v343_v48, %v340_v57  ;;  %361 = vperm.xlu0 %612, %v797_v58  }
 0x395   :  { %v800_v60 = vadd.f32 %v349_v51, %v347_v59 }
 0x397   :  { %614 = vset.pattern.permute.xlu0 %v663_v0  ;;  %366 = vperm.xlu1 %611, %v800_v60  }
 0x398   :  { %377 = vperm.xlu0 %614, %v797_v58  }
 0x39b   :  { %613 = vset.pattern.permute.xlu1 %v663_v0 }
 0x39c   :  { %616 = vset.pattern.permute.xlu0 %v665_v5  ;;  %373 = vperm.xlu1 %613, %v794_v52  }
 0x39d   :  { %395 = vperm.xlu0 %616, %v797_v58  }
 0x3a0   :  { %381 = vperm.xlu1 %613, %v800_v60  }
 0x3a1   :  { %618 = vset.pattern.permute.xlu0 %v666_v6 }
 0x3a2   :  { %413 = vperm.xlu0 %618, %v797_v58  }
 0x3a4   :  { %615 = vset.pattern.permute.xlu1 %v665_v5 }
 0x3a5   :  { %391 = vperm.xlu1 %615, %v794_v52  }
 0x3a6   :  { %620 = vset.pattern.permute.xlu0 %v672_v61 }
 0x3a9   :  { %399 = vperm.xlu1 %615, %v800_v60  }
 0x3ad   :  { %617 = vset.pattern.permute.xlu1 %v666_v6 }
 0x3ae   :  { %409 = vperm.xlu1 %617, %v794_v52  }
 0x3b2   :  { %417 = vperm.xlu1 %617, %v800_v60  }
 0x3b6   :  { %619 = vset.pattern.permute.xlu1 %v672_v61 }
 0x407   :  { %v357_v0 = vpop.permute.xlu1 %356 }
 0x408   :  { %v369_v25 = vmul.f32 %v357_v0, %v734_v20 }
 0x412   :  { %v362_v62 = vpop.permute.xlu0 %361 }
 0x413   :  { %v370_v10 = vmul.f32 %v362_v62, %v734_v20 }
 0x416   :  { %v367_v63 = vpop.permute.xlu1 %366 }
 0x417   :  { %v378_v7 = vpop.permute.xlu0 %377  ;;  %v371_v30 = vmul.f32 %v367_v63, %v734_v20 }
 0x418   :  { %v385_v5 = vmul.f32 %v378_v7, %v732_v19 }
 0x41a   :  { %v388_v13 = vadd.f32 %v385_v5, %v370_v10 }
 0x41b   :  { %v374_v8 = vpop.permute.xlu1 %373 }
 0x41c   :  { %v396_v9 = vpop.permute.xlu0 %395  ;;  %v384_v22 = vmul.f32 %v374_v8, %v732_v19 }
 0x41d   :  { %v403_v11 = vmul.f32 %v396_v9, %v736_v21 }
 0x41e   :  { %v387_v27 = vadd.f32 %v384_v22, %v369_v25 }
 0x41f   :  { %v382_v12 = vpop.permute.xlu1 %381  ;;  %v406_v14 = vadd.f32 %v403_v11, %v388_v13 }
 0x420   :  { %v386_v29 = vmul.f32 %v382_v12, %v732_v19 }
 0x421   :  { %v414_v6 = vpop.permute.xlu0 %413 }
 0x422   :  { %v421_v15 = vmul.f32 %v414_v6, %v741_v28  ;;  %v389_v34 = vadd.f32 %v386_v29, %v371_v30 }
 0x424   :  { %v424_v16 = vadd.f32 %v421_v15, %v406_v14  ;;  %v392_v17 = vpop.permute.xlu1 %391 }
 0x425   :  { %v402_v26 = vmul.f32 %v392_v17, %v736_v21 }
 0x426   :  { %v427_v18 = vadd.f32 %v750_v37, %v424_v16 }
 0x427   :  { %v405_v31 = vadd.f32 %v402_v26, %v387_v27 }
 0x428   :  { %v430_v23 = vmax.f32 %v427_v18, 0.0  ;;  %v400_v24 = vpop.permute.xlu1 %399 }
 0x429   :  { %v404_v32 = vmul.f32 %v400_v24, %v736_v21 }
 0x42a   :  { %439 = vperm.xlu0 %620, %v430_v23  }
 0x42b   :  { %v407_v4 = vadd.f32 %v404_v32, %v389_v34 }
 0x42d   :  { %v410_v2 = vpop.permute.xlu1 %409 }
 0x42e   :  { %v420_v3 = vmul.f32 %v410_v2, %v741_v28  ;;  %622 = vset.pattern.permute.xlu0 %v673_v33 }
 0x42f   :  { %455 = vperm.xlu0 %622, %v430_v23  }
 0x430   :  { %v423_v35 = vadd.f32 %v420_v3, %v405_v31 }
 0x431   :  { %v418_v36 = vpop.permute.xlu1 %417 }
 0x432   :  { %v426_v38 = vadd.f32 %v750_v37, %v423_v35  ;;  %v422_v39 = vmul.f32 %v418_v36, %v741_v28 }
 0x433   :  { %624 = vset.pattern.permute.xlu0 %v674_v40 }
 0x434   :  { %v429_v41 = vmax.f32 %v426_v38, 0.0  ;;  %v425_v42 = vadd.f32 %v422_v39, %v407_v4  ;;  %473 = vperm.xlu0 %624, %v430_v23  }
 0x436   :  { %v428_v43 = vadd.f32 %v750_v37, %v425_v42  ;;  %434 = vperm.xlu1 %619, %v429_v41  }
 0x438   :  { %v431_v44 = vmax.f32 %v428_v43, 0.0  ;;  %626 = vset.pattern.permute.xlu0 %v675_v45 }
 0x439   :  { %491 = vperm.xlu0 %626, %v430_v23  }
 0x43a   :  { %444 = vperm.xlu1 %619, %v431_v44  }
 0x43e   :  { %621 = vset.pattern.permute.xlu1 %v673_v33 }
 0x43f   :  { %451 = vperm.xlu1 %621, %v429_v41  }
 0x443   :  { %459 = vperm.xlu1 %621, %v431_v44  }
 0x447   :  { %623 = vset.pattern.permute.xlu1 %v674_v40 }
 0x448   :  { %469 = vperm.xlu1 %623, %v429_v41  }
 0x44c   :  { %477 = vperm.xlu1 %623, %v431_v44  }
 0x450   :  { %625 = vset.pattern.permute.xlu1 %v675_v45 }
 0x451   :  { %487 = vperm.xlu1 %625, %v429_v41  }
 0x455   :  { %495 = vperm.xlu1 %625, %v431_v44  }
 0x4a9   :  { %v440_v46 = vpop.permute.xlu0 %439 }
 0x4aa   :  { %v448_v1 = vmul.f32 %v440_v46, %v734_v20 }
 0x4ae   :  { %v456_v47 = vpop.permute.xlu0 %455 }
 0x4af   :  { %v463_v48 = vmul.f32 %v456_v47, %v732_v19 }
 0x4b1   :  { %v466_v53 = vadd.f32 %v463_v48, %v448_v1 }
 0x4b3   :  { %v474_v49 = vpop.permute.xlu0 %473 }
 0x4b4   :  { %v481_v50 = vmul.f32 %v474_v49, %v736_v21 }
 0x4b5   :  { %v435_v51 = vpop.permute.xlu1 %434 }
 0x4b6   :  { %v484_v55 = vadd.f32 %v481_v50, %v466_v53  ;;  %v447_v5 = vmul.f32 %v435_v51, %v734_v20 }
 0x4b8   :  { %v492_v54 = vpop.permute.xlu0 %491 }
 0x4b9   :  { %v499_v56 = vmul.f32 %v492_v54, %v741_v28  ;;  %v445_v57 = vpop.permute.xlu1 %444 }
 0x4ba   :  { %v449_v13 = vmul.f32 %v445_v57, %v734_v20 }
 0x4bb   :  { %v502_v59 = vadd.f32 %v499_v56, %v484_v55 }
 0x4bd   :  { %v505_v61 = vadd.f32 %v750_v37, %v502_v59 }
 0x4be   :  { %v452_v0 = vpop.permute.xlu1 %451 }
 0x4bf   :  { %512 = vrot.lane.b32.xlu0 %v505_v61, %s676_s22  ;;  %v462_v7 = vmul.f32 %v452_v0, %v732_v19 }
 0x4c1   :  { %v465_v10 = vadd.f32 %v462_v7, %v447_v5 }
 0x4c2   :  { %v460_v62 = vpop.permute.xlu1 %459 }
 0x4c3   :  { %v464_v11 = vmul.f32 %v460_v62, %v732_v19 }
 0x4c5   :  { %v467_v16 = vadd.f32 %v464_v11, %v449_v13 }
 0x4c7   :  { %v470_v63 = vpop.permute.xlu1 %469 }
 0x4c8   :  { %v480_v9 = vmul.f32 %v470_v63, %v736_v21 }
 0x4ca   :  { %v483_v6 = vadd.f32 %v480_v9, %v465_v10 }
 0x4cb   :  { %v478_v8 = vpop.permute.xlu1 %477 }
 0x4cc   :  { %v482_v14 = vmul.f32 %v478_v8, %v736_v21 }
 0x4ce   :  { %v485_v22 = vadd.f32 %v482_v14, %v467_v16 }
 0x4d0   :  { %v488_v12 = vpop.permute.xlu1 %487 }
 0x4d1   :  { %v498_v15 = vmul.f32 %v488_v12, %v741_v28 }
 0x4d3   :  { %v501_v17 = vadd.f32 %v498_v15, %v483_v6 }
 0x4d4   :  { %v496_v18 = vpop.permute.xlu1 %495 }
 0x4d5   :  { %v500_v23 = vmul.f32 %v496_v18, %v741_v28  ;;  %v504_v24 = vadd.f32 %v750_v37, %v501_v17 }
 0x4d7   :  { %v503_v25 = vadd.f32 %v500_v23, %v485_v22  ;;  %510 = vrot.lane.b32.xlu1 %v504_v24, %s676_s22 }
 0x4d9   :  { %v506_v19 = vadd.f32 %v750_v37, %v503_v25 }
 0x4db   :  { %514 = vrot.lane.b32.xlu1 %v506_v19, %s676_s22 }
 0x531   :  { %v513_v26 = vpop.permute.xlu0 %512 }
 0x532   :  { %v520_v20 = vadd.f32 %v513_v26, %v797_v58 }
 0x534   :  { %v525_v21 = vsel %vm300_vm0, %v520_v20, 0.0 }
 0x535   :  { %526 = vadd.xlane.f32.xlu1 %v525_v21 }
 0x549   :  { %v511_v27 = vpop.permute.xlu1 %510 }
 0x54a   :  { %v519_v29 = vadd.f32 %v511_v27, %v794_v52 }
 0x54c   :  { %v522_v2 = vsel %vm300_vm0, %v519_v29, 0.0 }
 0x54d   :  { %523 = vadd.xlane.f32.xlu0 %v522_v2  ;;  %v515_v28 = vpop.permute.xlu1 %514 }
 0x54e   :  { %v521_v30 = vadd.f32 %v515_v28, %v800_v60 }
 0x550   :  { %v528_v31 = vsel %vm300_vm0, %v521_v30, 0.0 }
 0x551   :  { %529 = vadd.xlane.f32.xlu0 %v528_v31 }
 0x5c2   :  { %v527_v32 = vpop.xlane.xlu1 %526 }
 0x5c3   :  { %v532_v3 = vmul.f32 0.25, %v527_v32 }
 0x5c5   :  { %v535_v33 = vsub.f32 %v520_v20, %v532_v3 }
 0x5c7   :  { %v538_v34 = vmul.f32 %v535_v33, %v535_v33 }
 0x5c9   :  { %v543_v58 = vsel %vm300_vm0, %v538_v34, 0.0 }
 0x5ca   :  { %544 = vadd.xlane.f32.xlu1 %v543_v58 }
 0x5da   :  { %v524_v35 = vpop.xlane.xlu0 %523 }
 0x5db   :  { %v531_v36 = vmul.f32 0.25, %v524_v35  ;;  %561 = vrot.lane.b32.xlu1 %v750_v37, %s677_s23 }
 0x5dd   :  { %v534_v52 = vsub.f32 %v519_v29, %v531_v36 }
 0x5de   :  { %v530_v4 = vpop.xlane.xlu0 %529 }
 0x5df   :  { %v533_v38 = vmul.f32 0.25, %v530_v4  ;;  %v537_v39 = vmul.f32 %v534_v52, %v534_v52 }
 0x5e1   :  { %v536_v60 = vsub.f32 %v521_v30, %v533_v38  ;;  %v540_v40 = vsel %vm300_vm0, %v537_v39, 0.0 }
 0x5e2   :  { %541 = vadd.xlane.f32.xlu0 %v540_v40 }
 0x5e3   :  { %v539_v41 = vmul.f32 %v536_v60, %v536_v60 }
 0x5e5   :  { %v546_v42 = vsel %vm300_vm0, %v539_v41, 0.0 }
 0x5e6   :  { %547 = vadd.xlane.f32.xlu0 %v546_v42 }
 0x5fc   :  { %567 = vrot.lane.b32.xlu0 %v750_v37, %s678_s24 }
 0x657   :  { %v545_v43 = vpop.xlane.xlu1 %544 }
 0x658   :  { %v550_v44 = vmul.f32 0.25, %v545_v43 }
 0x65a   :  { %v553_v45 = vadd.f32 1e-05, %v550_v44 }
 0x65b   :  { %v562_v50 = vpop.permute.xlu1 %561 }
 0x65c   :  { %657 = vrsqrt.f32 %v553_v45 }
 0x666   :  { %v658_v46 = vpop.eup %657 }
 0x667   :  { %v559_v49 = vmul.f32 %v658_v46, %v535_v33 }
 0x669   :  { %v565_v54 = vmul.f32 %v562_v50, %v559_v49 }
 0x66f   :  { %v542_v47 = vpop.xlane.xlu0 %541 }
 0x670   :  { %v549_v48 = vmul.f32 0.25, %v542_v47 }
 0x672   :  { %v552_v1 = vadd.f32 1e-05, %v549_v48 }
 0x673   :  { %v548_v51 = vpop.xlane.xlu0 %547 }
 0x674   :  { %659 = vrsqrt.f32 %v552_v1  ;;  %v551_v53 = vmul.f32 0.25, %v548_v51 }
 0x676   :  { %v554_v55 = vadd.f32 1e-05, %v551_v53 }
 0x677   :  { %v568_v56 = vpop.permute.xlu0 %567 }
 0x678   :  { %661 = vrsqrt.f32 %v554_v55  ;;  %v571_v57 = vadd.f32 %v568_v56, %v565_v54 }
 0x67a   :  { %574 = vst.msk [vmem:[%s873_s2 + $0x8] sm:$0x1f] %vm300_vm0, %v571_v57 }
 0x67e   :  { %v660_v37 = vpop.eup %659 }
 0x67f   :  { %v558_v59 = vmul.f32 %v660_v37, %v534_v52 }
 0x681   :  { %v564_v61 = vmul.f32 %v562_v50, %v558_v59 }
 0x682   :  { %v662_v0 = vpop.eup %661 }
 0x683   :  { %v560_v62 = vmul.f32 %v662_v0, %v536_v60  ;;  %v570_v63 = vadd.f32 %v568_v56, %v564_v61 }
 0x685   :  { %v566_v7 = vmul.f32 %v562_v50, %v560_v62  ;;  %573 = vst.msk [vmem:[%s873_s2] sm:$0x1f] %vm300_vm0, %v570_v63 }
 0x687   :  { %v572_v8 = vadd.f32 %v568_v56, %v566_v7 }
 0x689   :  { %575 = vst.msk [vmem:[%s873_s2 + $0x10] sm:$0x1f] %vm300_vm0, %v572_v8 }

</bundles_post_ra>
